<compile_context>
chip_gen: v6e
topology: v6e:2x2x1
jax: 0.10.0
libtpu: 0.0.40
codegen_flags: <defaults>
</compile_context>

<pallas_src>
import functools

import jax
import jax.numpy as jnp
from jax.experimental import pallas as pl
from jax.experimental.pallas import tpu as pltpu


def _round_up(x, m):
    return ((x + m - 1) // m) * m


def _hyperlogic_kernel(x_ref, w1_ref, b1_ref, w2_ref, b2_ref, mult_ref, o_ref,
                       *, compute_dtype):
    # x_ref:    (tm, dim)   input tile, original dtype (exact residual add)
    # w1_ref:   (dim, hid)  W1^T in compute_dtype (bf16 -> native MXU)
    # b1_ref:   (1, hid)    f32
    # w2_ref:   (hid, dim)  W2^T in compute_dtype
    # b2_ref:   (1, dim)    f32
    # mult_ref: (1,)        f32 scalar in SMEM
    x = x_ref[...]
    xc = x.astype(compute_dtype)
    h = jnp.dot(xc, w1_ref[...], preferred_element_type=jnp.float32) + b1_ref[...]
    y = jnp.dot(h.astype(compute_dtype), w2_ref[...],
                preferred_element_type=jnp.float32) + b2_ref[...]
    o_ref[...] = (x.astype(jnp.float32) + y * mult_ref[0]).astype(o_ref.dtype)


def _vmem_capacity_bytes():
    try:
        return int(pltpu.get_tpu_info().vmem_capacity_bytes)
    except Exception:
        return 128 * 1024 * 1024   # v5e/v6e physical VMEM as a safe default


def hyperlogic_forward(x, w1_t, b1, w2_t, b2, multiplier=1.0, *, tm=None,
                       compute_dtype=jnp.bfloat16):
    """x: (..., dim). Returns x + ((x @ W1^T + b1) @ W2^T + b2) * multiplier."""
    orig_shape = x.shape
    dim = orig_shape[-1]
    hid = 2 * dim
    x2d = x.reshape(-1, dim)          # metadata-only reshape, no HBM copy
    M = x2d.shape[0]
    dtype = x.dtype
    x_isz = jnp.dtype(dtype).itemsize
    w_isz = jnp.dtype(compute_dtype).itemsize

    # Per-generation scoped-VMEM limit: ~96 MiB on 128-MiB chips (v5e/v6e),
    # ~48 MiB on v7x (64 MiB physical per TensorCore).
    vmem_cap = _vmem_capacity_bytes()
    vmem_limit = max(32 * 1024 * 1024, int(vmem_cap * 0.75))

    # Per-generation default row tile.
    if tm is None:
        if vmem_cap >= 96 * 1024 * 1024:          # v5e / v6e
            tm = 1024 if dim <= 768 else 512
        else:                                     # v7x
            tm = 512 if dim <= 768 else 256

    # Clamp to the problem size, then rebalance so all grid steps carry roughly
    # equal rows (keeps v7x's two TensorCores balanced on ragged M).
    tm = max(8, min(_round_up(tm, 8), _round_up(M, 8)))
    grid_m = pl.cdiv(M, tm)
    tm = max(8, _round_up(pl.cdiv(M, grid_m), 8))
    grid_m = pl.cdiv(M, tm)

    # Soft VMEM budget (assume double-buffered weights for the fallback path,
    # double-buffered x/out tiles, f32+bf16 h/y temporaries); shrink tm if the
    # estimate does not fit comfortably under the scoped limit.
    def _est_vmem(t):
        weights = 2 * (2 * dim * hid * w_isz)
        io = 2 * t * dim * (2 * x_isz)
        temps = t * hid * (4 + w_isz) + t * dim * (4 + w_isz)
        return weights + io + temps + (hid + dim) * 4

    while tm > 64 and _est_vmem(tm) > 0.8 * vmem_limit:
        tm = max(64, _round_up(tm // 2, 8))
        grid_m = pl.cdiv(M, tm)

    # No padding: blocks span the full feature dims; last row block is masked.
    w1_p = w1_t.astype(compute_dtype)
    w2_p = w2_t.astype(compute_dtype)
    b1_p = b1.reshape(1, hid).astype(jnp.float32)
    b2_p = b2.reshape(1, dim).astype(jnp.float32)
    mult = jnp.asarray([multiplier], dtype=jnp.float32)

    kernel = functools.partial(_hyperlogic_kernel, compute_dtype=compute_dtype)

    cost = pl.CostEstimate(
        flops=4 * M * dim * hid,                          # two matmuls
        transcendentals=0,
        bytes_accessed=(2 * M * dim * x_isz               # x in + out
                        + 2 * dim * hid * w_isz           # W1^T + W2^T
                        + (hid + dim) * 4),               # biases (f32)
    )

    def _build(single_buffer_weights):
        if single_buffer_weights:
            def const_spec(shape):
                # Grid-invariant block: single-buffer to halve weight VMEM.
                return pl.BlockSpec(shape, lambda i: (0,) * len(shape),
                                    pipeline_mode=pl.Buffered(1))
        else:
            def const_spec(shape):
                return pl.BlockSpec(shape, lambda i: (0,) * len(shape))

        grid_spec = pltpu.PrefetchScalarGridSpec(
            num_scalar_prefetch=0,
            grid=(grid_m,),
            in_specs=[
                pl.BlockSpec((tm, dim), lambda i: (i, 0)),            # x tile
                const_spec((dim, hid)),                               # W1^T
                const_spec((1, hid)),                                 # b1
                const_spec((hid, dim)),                               # W2^T
                const_spec((1, dim)),                                 # b2
                pl.BlockSpec(memory_space=pltpu.MemorySpace.SMEM),    # multiplier
            ],
            out_specs=pl.BlockSpec((tm, dim), lambda i: (i, 0)),
        )
        return pl.pallas_call(
            kernel,
            out_shape=jax.ShapeDtypeStruct((M, dim), dtype),
            grid_spec=grid_spec,
            compiler_params=pltpu.CompilerParams(
                dimension_semantics=("parallel",),   # M axis shards across TCs (v7x)
                vmem_limit_bytes=vmem_limit,
            ),
            cost_estimate=cost,
        )

    args = (x2d, w1_p, b1_p, w2_p, b2_p, mult)

    # Primary path: single-buffered weights. Probe support at build/lower time
    # only (no execution inside try/except), so real runtime errors surface.
    call = None
    if hasattr(pl, "Buffered"):
        try:
            cand = _build(True)
            jax.jit(cand).lower(*args)   # trace + lower probe, never executed
            call = cand
        except Exception:
            call = None
    if call is None:
        call = _build(False)

    out = call(*args)
    return out.reshape(orig_shape)


def _reference(x, w1_t, b1, w2_t, b2, multiplier, compute_dtype=None):
    """Pure-JAX reference. compute_dtype=None -> full f32; else matches kernel."""
    xf = x.astype(jnp.float32)
    if compute_dtype is None:
        a, w1c, w2c = xf, w1_t.astype(jnp.float32), w2_t.astype(jnp.float32)
    else:
        a = x.astype(compute_dtype)
        w1c = w1_t.astype(compute_dtype)
        w2c = w2_t.astype(compute_dtype)
    h = jnp.dot(a, w1c, preferred_element_type=jnp.float32) + b1.astype(jnp.float32)
    if compute_dtype is not None:
        h = h.astype(compute_dtype)
    y = jnp.dot(h, w2c, preferred_element_type=jnp.float32) + b2.astype(jnp.float32)
    return (xf + y * multiplier).astype(x.dtype)


if __name__ == "__main__":
    # Small shapes consistent with the module: context [B, S, dim];
    # dim=320 is one of HyperLogic's real widths (non-128-multiple lane dim).
    B, S, dim = 2, 8, 320
    key = jax.random.PRNGKey(0)
    kx, kw1, kb1, kw2, kb2 = jax.random.split(key, 5)

    x = jax.random.normal(kx, (B, S, dim), dtype=jnp.float32)

    # torch.nn.Linear(dim, 2*dim): weight (2*dim, dim), bias (2*dim,).
    # We pass the transposed weights (dim, 2*dim) / (2*dim, dim).
    bound1 = 1.0 / jnp.sqrt(dim)
    w1_t = jax.random.uniform(kw1, (dim, 2 * dim), minval=-bound1, maxval=bound1,
                              dtype=jnp.float32)
    b1 = jax.random.uniform(kb1, (2 * dim,), minval=-bound1, maxval=bound1,
                            dtype=jnp.float32)
    bound2 = 1.0 / jnp.sqrt(2 * dim)
    w2_t = jax.random.uniform(kw2, (2 * dim, dim), minval=-bound2, maxval=bound2,
                              dtype=jnp.float32)
    b2 = jax.random.uniform(kb2, (dim,), minval=-bound2, maxval=bound2,
                            dtype=jnp.float32)

    multiplier = 1.0  # HypernetworkDatabase.global_hypernetwork_multiplier

    out = hyperlogic_forward(x, w1_t, b1, w2_t, b2, multiplier)
    out = jax.block_until_ready(out)

    assert out.shape == x.shape and out.dtype == x.dtype

    # Check vs a reference that uses the same bf16-in/f32-accumulate matmuls.
    ref_bf16 = _reference(x, w1_t, b1, w2_t, b2, multiplier,
                          compute_dtype=jnp.bfloat16)
    assert jnp.allclose(out, ref_bf16, atol=2e-3, rtol=2e-3), \
        "mismatch vs bf16-matched reference"

    # Loose sanity check vs the full-f32 reference (bf16 matmul rounding only).
    ref_f32 = _reference(x, w1_t, b1, w2_t, b2, multiplier, compute_dtype=None)
    assert jnp.allclose(out, ref_f32, atol=5e-2, rtol=5e-2), \
        "mismatch vs f32 reference"

    print("KERNEL_OK")
</pallas_src>

<mosaic_0001>
module attributes {stable_mosaic.version = 11 : i64} {
  func.func @_hyperlogic_kernel(%arg0: i32, %arg1: memref<16x320xf32, #tpu.memory_space<vmem>>, %arg2: memref<320x640xbf16, #tpu.memory_space<vmem>>, %arg3: memref<1x640xf32, #tpu.memory_space<vmem>>, %arg4: memref<640x320xbf16, #tpu.memory_space<vmem>>, %arg5: memref<1x320xf32, #tpu.memory_space<vmem>>, %arg6: memref<1xf32, #tpu.memory_space<smem>>, %arg7: memref<16x320xf32, #tpu.memory_space<vmem>>) attributes {dimension_semantics = [#tpu.dimension_semantics<parallel>], iteration_bounds = array<i64: 1>, scalar_prefetch = 0 : i64, scratch_operands = 0 : i64, tpu.core_type = #tpu.core_type<tc>, window_params = [{transform_indices = @transform_0, window_bounds = array<i64: 16, 320>}, {pipeline_mode = #tpu.pipeline_mode<synchronous>, transform_indices = @transform_1, window_bounds = array<i64: 320, 640>}, {pipeline_mode = #tpu.pipeline_mode<synchronous>, transform_indices = @transform_2, window_bounds = array<i64: 1, 640>}, {pipeline_mode = #tpu.pipeline_mode<synchronous>, transform_indices = @transform_3, window_bounds = array<i64: 640, 320>}, {pipeline_mode = #tpu.pipeline_mode<synchronous>, transform_indices = @transform_4, window_bounds = array<i64: 1, 320>}, {transform_indices = @transform_5, window_bounds = array<i64: 1>}, {transform_indices = @transform_6, window_bounds = array<i64: 16, 320>}]} {
    %c0 = arith.constant 0 : index
    %c0_0 = arith.constant 0 : index
    %0 = vector.load %arg1[%c0, %c0_0] : memref<16x320xf32, #tpu.memory_space<vmem>>, vector<16x320xf32>
    %1 = arith.truncf %0 : vector<16x320xf32> to vector<16x320xbf16>
    %c0_1 = arith.constant 0 : index
    %c0_2 = arith.constant 0 : index
    %2 = vector.load %arg2[%c0_1, %c0_2] : memref<320x640xbf16, #tpu.memory_space<vmem>>, vector<320x640xbf16>
    %cst = arith.constant dense<0.000000e+00> : vector<16x640xf32>
    %3 = tpu.matmul %1, %2, %cst {dimension_numbers = #tpu.dot_dimension_numbers<[1], [0], [0], [1], [0, 0, 1, 1], [], []>} : vector<16x320xbf16>, vector<320x640xbf16>, vector<16x640xf32> -> vector<16x640xf32>
    %c0_3 = arith.constant 0 : index
    %c0_4 = arith.constant 0 : index
    %4 = vector.load %arg3[%c0_3, %c0_4] : memref<1x640xf32, #tpu.memory_space<vmem>>, vector<1x640xf32>
    %5 = vector.broadcast %4 : vector<1x640xf32> to vector<16x640xf32>
    %6 = arith.addf %3, %5 : vector<16x640xf32>
    %7 = arith.truncf %6 : vector<16x640xf32> to vector<16x640xbf16>
    %c0_5 = arith.constant 0 : index
    %c0_6 = arith.constant 0 : index
    %8 = vector.load %arg4[%c0_5, %c0_6] : memref<640x320xbf16, #tpu.memory_space<vmem>>, vector<640x320xbf16>
    %cst_7 = arith.constant dense<0.000000e+00> : vector<16x320xf32>
    %9 = tpu.matmul %7, %8, %cst_7 {dimension_numbers = #tpu.dot_dimension_numbers<[1], [0], [0], [1], [0, 0, 1, 1], [], []>} : vector<16x640xbf16>, vector<640x320xbf16>, vector<16x320xf32> -> vector<16x320xf32>
    %c0_8 = arith.constant 0 : index
    %c0_9 = arith.constant 0 : index
    %10 = vector.load %arg5[%c0_8, %c0_9] : memref<1x320xf32, #tpu.memory_space<vmem>>, vector<1x320xf32>
    %11 = vector.broadcast %10 : vector<1x320xf32> to vector<16x320xf32>
    %12 = arith.addf %9, %11 : vector<16x320xf32>
    %c0_10 = arith.constant 0 : index
    %13 = memref.load %arg6[%c0_10] : memref<1xf32, #tpu.memory_space<smem>>
    %14 = vector.broadcast %13 : f32 to vector<16x320xf32>
    %15 = arith.mulf %12, %14 : vector<16x320xf32>
    %16 = arith.addf %0, %15 : vector<16x320xf32>
    %c0_11 = arith.constant 0 : index
    %c0_12 = arith.constant 0 : index
    %17 = vector.load %arg7[%c0_11, %c0_12] : memref<16x320xf32, #tpu.memory_space<vmem>>, vector<16x320xf32>
    tpu.vector_store %arg7[%c0_11, %c0_12], %16 {strides = array<i32>} : memref<16x320xf32, #tpu.memory_space<vmem>>, vector<16x320xf32>,
    return
  }
  func.func @transform_0(%arg0: i32) -> (i32, i32) {
    %c0_i32 = arith.constant 0 : i32
    %c0_i32_0 = arith.constant 0 : i32
    return %arg0, %c0_i32 : i32, i32
  }
  func.func @transform_1(%arg0: i32) -> (i32, i32) {
    %c0_i32 = arith.constant 0 : i32
    %c0_i32_0 = arith.constant 0 : i32
    %c0_i32_1 = arith.constant 0 : i32
    return %c0_i32, %c0_i32_0 : i32, i32
  }
  func.func @transform_2(%arg0: i32) -> (i32, i32) {
    %c0_i32 = arith.constant 0 : i32
    %c0_i32_0 = arith.constant 0 : i32
    %c0_i32_1 = arith.constant 0 : i32
    return %c0_i32, %c0_i32_0 : i32, i32
  }
  func.func @transform_3(%arg0: i32) -> (i32, i32) {
    %c0_i32 = arith.constant 0 : i32
    %c0_i32_0 = arith.constant 0 : i32
    %c0_i32_1 = arith.constant 0 : i32
    return %c0_i32, %c0_i32_0 : i32, i32
  }
  func.func @transform_4(%arg0: i32) -> (i32, i32) {
    %c0_i32 = arith.constant 0 : i32
    %c0_i32_0 = arith.constant 0 : i32
    %c0_i32_1 = arith.constant 0 : i32
    return %c0_i32, %c0_i32_0 : i32, i32
  }
  func.func @transform_5(%arg0: i32) -> i32 {
    %c0_i32 = arith.constant 0 : i32
    %c0_i32_0 = arith.constant 0 : i32
    return %c0_i32 : i32
  }
  func.func @transform_6(%arg0: i32) -> (i32, i32) {
    %c0_i32 = arith.constant 0 : i32
    %c0_i32_0 = arith.constant 0 : i32
    return %arg0, %c0_i32 : i32, i32
  }
}

</mosaic_0001>

<bundles_post_ra>
// kernel: tpu_custom_call.1
= control target key start
LH: loop header
LB: loop body
LE: loop exit
PB: predicated region body
PF: predicated region fallthrough
CT: control target
= control target key end

     0   :  { %v2739_v2 = vmov 0   ;;  %vm702_vm0 = vcmask 523264   ;;  %vm2741_vm1 = vmmov 0   ;;  %s3565_s0 = inlined_call_operand.vmem [shape: f32[16,320], index: 0, kind: input, shape index: {}]   ;;  %s3566_s1 = inlined_call_operand.vmem [shape: bf16[320,640], index: 1, kind: input, shape index: {}]   ;;  %s3567_s2 = inlined_call_operand.vmem [shape: f32[1,640], index: 2, kind: input, shape index: {}]   ;;  %s3568_s3 = inlined_call_operand.vmem [shape: bf16[640,320], index: 3, kind: input, shape index: {}]   ;;  %s3569_s4 = inlined_call_operand.vmem [shape: f32[1,320], index: 4, kind: input, shape index: {}]   ;;  %s3570_s5 = inlined_call_operand.<no memory space> [shape: f32[1], index: 5, kind: input, shape index: {}]   ;;  %s3571_s6 = inlined_call_operand.hbm [shape: f32[16,320], index: 6, kind: output, shape index: {}]  }
   0x1   :  { %v2411_v0 = vld [vmem:[%s3566_s1 + $0x11c] ss:$20 sps:$4 sm:$0xff]   ;;  %781 = vmatprep.mubr.bf16.mxu1 %v2739_v2  ;;  %v2415_v3 = vld [vmem:[%s3566_s1 + $0x118] ss:$20 sps:$4 sm:$0xff]   ;;  %v2417_v5 = vld [vmem:[%s3566_s1 + $0xf4] ss:$20 sps:$4 sm:$0xff]  }
   0x2   :  { %v2413_v1 = vld [vmem:[%s3566_s1 + $0x2fc] ss:$20 sps:$4 sm:$0xff]   ;;  %706 = vmatprep.subr.bf16.mxu0 %v2411_v0  ;;  %v2416_v4 = vld [vmem:[%s3566_s1 + $0x2f8] ss:$20 sps:$4 sm:$0xff]   ;;  %v2419_v6 = vld [vmem:[%s3566_s1 + $0x2d4] ss:$20 sps:$4 sm:$0xff]  }
   0x3   :  { %757 = vmatprep.subr.bf16.mxu1 %v2413_v1  ;;  %707 = vmatpush1.bf16.msra.mxu0 %v2415_v3  ;;  %v2421_v7 = vld [vmem:[%s3566_s1 + $0xf0] ss:$20 sps:$4 sm:$0xff]   ;;  %v2423_v9 = vld [vmem:[%s3566_s1 + $0xcc] ss:$20 sps:$4 sm:$0xff]   ;;  %v2427_v11 = vld [vmem:[%s3566_s1 + $0xc8] ss:$20 sps:$4 sm:$0xff]  }
   0x4   :  { %758 = vmatpush1.bf16.msra.mxu1 %v2416_v4  ;;  %708 = vmatprep.subr.bf16.mxu0 %v2417_v5  ;;  %v2422_v8 = vld [vmem:[%s3566_s1 + $0x2d0] ss:$20 sps:$4 sm:$0xff]   ;;  %v2425_v10 = vld [vmem:[%s3566_s1 + $0x2ac] ss:$20 sps:$4 sm:$0xff]   ;;  %v2428_v12 = vld [vmem:[%s3566_s1 + $0x2a8] ss:$20 sps:$4 sm:$0xff]  }
   0x5   :  { %759 = vmatprep.subr.bf16.mxu1 %v2419_v6  ;;  %v2429_v13 = vld [vmem:[%s3566_s1 + $0xa4] ss:$20 sps:$4 sm:$0xff]   ;;  %v2433_v15 = vld [vmem:[%s3566_s1 + $0xa0] ss:$20 sps:$4 sm:$0xff]   ;;  %v2435_v17 = vld [vmem:[%s3566_s1 + $0x7c] ss:$20 sps:$4 sm:$0xff]  }
   0x6   :  { %v2431_v14 = vld [vmem:[%s3566_s1 + $0x284] ss:$20 sps:$4 sm:$0xff]   ;;  %v2434_v16 = vld [vmem:[%s3566_s1 + $0x280] ss:$20 sps:$4 sm:$0xff]   ;;  %v31_v20 = vld [vmem:[%s3565_s0 + $0x28] sm:$0xff] }
   0x7   :  { %709 = vmatpush1.bf16.msra.mxu0 %v2421_v7  ;;  %v2439_v18 = vld [vmem:[%s3566_s1 + $0x124] ss:$20 sps:$4 sm:$0xff]   ;;  %v28_v19 = vld [vmem:[%s3565_s0 + $0x10] sm:$0xff]  ;;  %v2447_v28 = vld [vmem:[%s3566_s1 + $0x2c] ss:$20 sps:$4 sm:$0xff]  }
   0x8   :  { %760 = vmatpush1.bf16.msra.mxu1 %v2422_v8  ;;  %710 = vmatprep.subr.bf16.mxu0 %v2423_v9  ;;  %v2437_v21 = vld [vmem:[%s3566_s1 + $0x120] ss:$20 sps:$4 sm:$0xff]   ;;  %v2844_v22 = vpack.c.bf16 %v31_v20, %v28_v19  ;;  %v2440_v23 = vld [vmem:[%s3566_s1 + $0x78] ss:$20 sps:$4 sm:$0xff]   ;;  %v2445_v25 = vld [vmem:[%s3566_s1 + $0xfc] ss:$20 sps:$4 sm:$0xff]  }
   0x9   :  { %761 = vmatprep.subr.bf16.mxu1 %v2425_v10  ;;  %v2441_v24 = vld [vmem:[%s3566_s1 + $0x54] ss:$20 sps:$4 sm:$0xff]   ;;  %v2443_v26 = vld [vmem:[%s3566_s1 + $0xf8] ss:$20 sps:$4 sm:$0xff]   ;;  %v2446_v27 = vld [vmem:[%s3566_s1 + $0x50] ss:$20 sps:$4 sm:$0xff]  }
   0xa   :  { %v2451_v29 = vld [vmem:[%s3566_s1 + $0xd4] ss:$20 sps:$4 sm:$0xff]   ;;  %v2449_v30 = vld [vmem:[%s3566_s1 + $0xd0] ss:$20 sps:$4 sm:$0xff]   ;;  %v2457_v33 = vld [vmem:[%s3566_s1 + $0xac] ss:$20 sps:$4 sm:$0xff]  }
   0xb   :  { %711 = vmatpush1.bf16.msra.mxu0 %v2427_v11  ;;  %v2452_v31 = vld [vmem:[%s3566_s1 + $0x28] ss:$20 sps:$4 sm:$0xff]   ;;  %v2453_v32 = vld [vmem:[%s3566_s1 + $0x4] ss:$20 sps:$4 sm:$0xff]   ;;  %v2458_v35 = vld [vmem:[%s3566_s1] ss:$20 sps:$4 sm:$0xff]  }
   0xc   :  { %762 = vmatpush1.bf16.msra.mxu1 %v2428_v12  ;;  %712 = vmatprep.subr.bf16.mxu0 %v2429_v13  ;;  %v2455_v34 = vld [vmem:[%s3566_s1 + $0xa8] ss:$20 sps:$4 sm:$0xff]   ;;  %v2463_v37 = vld [vmem:[%s3566_s1 + $0x84] ss:$20 sps:$4 sm:$0xff]   ;;  %v2461_v38 = vld [vmem:[%s3566_s1 + $0x80] ss:$20 sps:$4 sm:$0xff]  }
   0xd   :  { %763 = vmatprep.subr.bf16.mxu1 %v2431_v14  ;;  %v2459_v36 = vld [vmem:[%s3566_s1 + $0x25c] ss:$20 sps:$4 sm:$0xff]   ;;  %v2464_v39 = vld [vmem:[%s3566_s1 + $0x258] ss:$20 sps:$4 sm:$0xff]   ;;  %v2465_v40 = vld [vmem:[%s3566_s1 + $0x234] ss:$20 sps:$4 sm:$0xff]  }
   0xe   :  { %v2469_v41 = vld [vmem:[%s3566_s1 + $0x5c] ss:$20 sps:$4 sm:$0xff]   ;;  %v2467_v42 = vld [vmem:[%s3566_s1 + $0x58] ss:$20 sps:$4 sm:$0xff]   ;;  %v2475_v45 = vld [vmem:[%s3566_s1 + $0x34] ss:$20 sps:$4 sm:$0xff]  }
   0xf   :  { %713 = vmatpush1.bf16.msra.mxu0 %v2433_v15  ;;  %v2470_v43 = vld [vmem:[%s3566_s1 + $0x230] ss:$20 sps:$4 sm:$0xff]   ;;  %v2471_v44 = vld [vmem:[%s3566_s1 + $0x20c] ss:$20 sps:$4 sm:$0xff]   ;;  %v2476_v47 = vld [vmem:[%s3566_s1 + $0x208] ss:$20 sps:$4 sm:$0xff]  }
  0x10   :  { %764 = vmatpush1.bf16.msra.mxu1 %v2434_v16  ;;  %714 = vmatprep.subr.bf16.mxu0 %v2435_v17  ;;  %v2473_v46 = vld [vmem:[%s3566_s1 + $0x30] ss:$20 sps:$4 sm:$0xff]   ;;  %v2481_v49 = vld [vmem:[%s3566_s1 + $0xc] ss:$20 sps:$4 sm:$0xff]   ;;  %v2479_v52 = vld [vmem:[%s3566_s1 + $0x8] ss:$20 sps:$4 sm:$0xff]  }
  0x11   :  { %792 = vmatprep.subr.bf16.mxu1 %v2439_v18  ;;  %v2477_v48 = vld [vmem:[%s3566_s1 + $0x1e4] ss:$20 sps:$4 sm:$0xff]   ;;  %v27_v50 = vld [vmem:[%s3565_s0 + $0x8] sm:$0xff]  ;;  %v2482_v53 = vld [vmem:[%s3566_s1 + $0x1e0] ss:$20 sps:$4 sm:$0xff]  }
  0x12   :  { %v30_v51 = vld [vmem:[%s3565_s0 + $0x20] sm:$0xff]  ;;  %v2483_v55 = vld [vmem:[%s3566_s1 + $0x1bc] ss:$20 sps:$4 sm:$0xff]   ;;  %v2488_v58 = vld [vmem:[%s3566_s1 + $0x1b8] ss:$20 sps:$4 sm:$0xff]  }
  0x13   :  { %2170 = vmatmul.mubr.msk.bf16.vlgmr.msra.gmra.mxu1 %vm702_vm0, %v2844_v22  ;;  %715 = vmatpush1.bf16.msra.mxu0 %v2440_v23  ;;  %v2941_v54 = vpack.c.bf16 %v30_v51, %v27_v50  ;;  %v2487_v56 = vld [vmem:[%s3566_s1 + $0x264] ss:$20 sps:$4 sm:$0xff]   ;;  %v2485_v57 = vld [vmem:[%s3566_s1 + $0x260] ss:$20 sps:$4 sm:$0xff]   ;;  %v2493_v60 = vld [vmem:[%s3566_s1 + $0x23c] ss:$20 sps:$4 sm:$0xff]  }
  0x14   :  { %793 = vmatpush1.bf16.msra.mxu1 %v2437_v21  ;;  %716 = vmatprep.subr.bf16.mxu0 %v2441_v24  ;;  %v2489_v59 = vld [vmem:[%s3566_s1 + $0x194] ss:$20 sps:$4 sm:$0xff]   ;;  %v2491_v61 = vld [vmem:[%s3566_s1 + $0x238] ss:$20 sps:$4 sm:$0xff]   ;;  %v2494_v62 = vld [vmem:[%s3566_s1 + $0x190] ss:$20 sps:$4 sm:$0xff]  }
  0x15   :  { %794 = vmatprep.subr.bf16.mxu1 %v2445_v25  ;;  %738 = vmatprep.mubr.bf16.mxu0 %v2941_v54  ;;  %v2495_v63 = vld [vmem:[%s3566_s1 + $0x16c] ss:$20 sps:$4 sm:$0xff]   ;;  %v2499_v0 = vld [vmem:[%s3566_s1 + $0x214] ss:$20 sps:$4 sm:$0xff]   ;;  %v2497_v1 = vld [vmem:[%s3566_s1 + $0x210] ss:$20 sps:$4 sm:$0xff]  }
  0x16   :  { %824 = vmatprep.mubr.bf16.mxu1 %v2941_v54  ;;  %v2500_v3 = vld [vmem:[%s3566_s1 + $0x168] ss:$20 sps:$4 sm:$0xff]   ;;  %v2501_v4 = vld [vmem:[%s3566_s1 + $0x144] ss:$20 sps:$4 sm:$0xff]   ;;  %v2505_v5 = vld [vmem:[%s3566_s1 + $0x1ec] ss:$20 sps:$4 sm:$0xff]  }
  0x17   :  { %717 = vmatpush1.bf16.msra.mxu0 %v2446_v27  ;;  %v2503_v6 = vld [vmem:[%s3566_s1 + $0x1e8] ss:$20 sps:$4 sm:$0xff]   ;;  %v2506_v7 = vld [vmem:[%s3566_s1 + $0x140] ss:$20 sps:$4 sm:$0xff]   ;;  %v2509_v10 = vld [vmem:[%s3566_s1 + $0x1c4] ss:$20 sps:$4 sm:$0xff]  }
  0x18   :  { %795 = vmatpush1.bf16.msra.mxu1 %v2443_v26  ;;  %718 = vmatprep.subr.bf16.mxu0 %v2447_v28  ;;  %v26_v8 = vld [vmem:[%s3565_s0] sm:$0xff]  ;;  %v29_v9 = vld [vmem:[%s3565_s0 + $0x18] sm:$0xff]  ;;  %v2521_v19 = vld [vmem:[%s3566_s1 + $0x174] ss:$20 sps:$4 sm:$0xff]  }
  0x19   :  { %796 = vmatprep.subr.bf16.mxu1 %v2451_v29  ;;  %v2512_v11 = vld [vmem:[%s3566_s1 + $0x304] ss:$20 sps:$4 sm:$0xff]   ;;  %v2507_v12 = vld [vmem:[%s3566_s1 + $0x1c0] ss:$20 sps:$4 sm:$0xff]   ;;  %v3008_v13 = vpack.c.bf16 %v29_v9, %v26_v8  ;;  %v2515_v15 = vld [vmem:[%s3566_s1 + $0x19c] ss:$20 sps:$4 sm:$0xff]  }
  0x1a   :  { %v2510_v14 = vld [vmem:[%s3566_s1 + $0x300] ss:$20 sps:$4 sm:$0xff]   ;;  %v2518_v16 = vld [vmem:[%s3566_s1 + $0x2dc] ss:$20 sps:$4 sm:$0xff]   ;;  %v2513_v17 = vld [vmem:[%s3566_s1 + $0x198] ss:$20 sps:$4 sm:$0xff]  }
  0x1b   :  { %719 = vmatpush1.bf16.msra.mxu0 %v2452_v31  ;;  %v2516_v18 = vld [vmem:[%s3566_s1 + $0x2d8] ss:$20 sps:$4 sm:$0xff]   ;;  %v2524_v20 = vld [vmem:[%s3566_s1 + $0x2b4] ss:$20 sps:$4 sm:$0xff]   ;;  %v2519_v21 = vld [vmem:[%s3566_s1 + $0x170] ss:$20 sps:$4 sm:$0xff]  }
  0x1c   :  { %797 = vmatpush1.bf16.msra.mxu1 %v2449_v30  ;;  %720 = vmatprep.subr.bf16.mxu0 %v2453_v32  ;;  %v2522_v23 = vld [vmem:[%s3566_s1 + $0x2b0] ss:$20 sps:$4 sm:$0xff]   ;;  %v2527_v24 = vld [vmem:[%s3566_s1 + $0x14c] ss:$20 sps:$4 sm:$0xff]   ;;  %v2525_v26 = vld [vmem:[%s3566_s1 + $0x148] ss:$20 sps:$4 sm:$0xff]  }
  0x1d   :  { %798 = vmatprep.subr.bf16.mxu1 %v2457_v33  ;;  %v2530_v25 = vld [vmem:[%s3566_s1 + $0x28c] ss:$20 sps:$4 sm:$0xff]   ;;  %v2528_v27 = vld [vmem:[%s3566_s1 + $0x288] ss:$20 sps:$4 sm:$0xff]   ;;  %v2740_v32 = vmov 0.0  }
  0x1e   :  { %v2531_v28 = vld [vmem:[%s3566_s1 + $0x268] ss:$20 sps:$4 sm:$0xff]   ;;  %v2533_v31 = vld [vmem:[%s3566_s1 + $0x240] ss:$20 sps:$4 sm:$0xff]   ;;  %v2546_v50 = vld [vmem:[%s3566_s1 + $0x38] ss:$20 sps:$4 sm:$0xff]  }
  0x1f   :  { %721 = vmatpush1.bf16.msra.mxu0 %v2458_v35  ;;  %v2532_v29 = vld [vmem:[%s3566_s1 + $0x128] ss:$20 sps:$4 sm:$0xff]   ;;  %v2534_v33 = vld [vmem:[%s3566_s1 + $0x100] ss:$20 sps:$4 sm:$0xff]   ;;  %v2548_v51 = vld [vmem:[%s3566_s1 + $0x150] ss:$20 sps:$4 sm:$0xff]  }
  0x20   :  { %799 = vmatpush1.bf16.msra.mxu1 %v2455_v34  ;;  %722 = vmatprep.subr.bf16.mxu0 %v2459_v36  ;;  %v2541_v30 = vld [vmem:[%s3566_s1 + $0x308] ss:$20 sps:$4 sm:$0xff]   ;;  %v2535_v34 = vld [vmem:[%s3566_s1 + $0x218] ss:$20 sps:$4 sm:$0xff]   ;;  %v2544_v35 = vld [vmem:[%s3566_s1 + $0x2e0] ss:$20 sps:$4 sm:$0xff]  }
  0x21   :  { %800 = vmatprep.subr.bf16.mxu1 %v2463_v37  ;;  %v2536_v36 = vld [vmem:[%s3566_s1 + $0xd8] ss:$20 sps:$4 sm:$0xff]  }
  0x22   :  { %v2547_v37 = vld [vmem:[%s3566_s1 + $0x2b8] ss:$20 sps:$4 sm:$0xff]  }
  0x23   :  { %723 = vmatpush2.bf16.msra.mxu0 %v2464_v39  ;;  %v2538_v39 = vld [vmem:[%s3566_s1 + $0xb0] ss:$20 sps:$4 sm:$0xff]   ;;  %v2584_v8 = vld [vmem:[%s3568_s3] ss:$12 sps:$4 sm:$0xff]  }
  0x24   :  { %801 = vmatpush1.bf16.msra.mxu1 %v2461_v38  ;;  %724 = vmatprep.subr.bf16.mxu0 %v2465_v40  ;;  %v2537_v38 = vld [vmem:[%s3566_s1 + $0x1f0] ss:$20 sps:$4 sm:$0xff]   ;;  %v2589_v9 = vld [vmem:[%s3568_s3 + $0x1cc] ss:$12 sps:$4 sm:$0xff]  }
  0x25   :  { %802 = vmatprep.subr.bf16.mxu1 %v2469_v41  ;;  %v2550_v40 = vld [vmem:[%s3566_s1 + $0x290] ss:$20 sps:$4 sm:$0xff]   ;;  %v2539_v41 = vld [vmem:[%s3566_s1 + $0x1c8] ss:$20 sps:$4 sm:$0xff]  }
  0x27   :  { %725 = vmatpush2.bf16.msra.mxu0 %v2470_v43  ;;  %v2540_v43 = vld [vmem:[%s3566_s1 + $0x88] ss:$20 sps:$4 sm:$0xff]  }
  0x28   :  { %803 = vmatpush1.bf16.msra.mxu1 %v2467_v42  ;;  %726 = vmatprep.subr.bf16.mxu0 %v2471_v44  ;;  %v2553_v42 = vld [vmem:[%s3568_s3 + $0xac] ss:$12 sps:$4 sm:$0xff]   ;;  %v2551_v44 = vld [vmem:[%s3568_s3 + $0xa8] ss:$12 sps:$4 sm:$0xff]  }
  0x29   :  { %804 = vmatprep.subr.bf16.mxu1 %v2475_v45  ;;  %v2542_v45 = vld [vmem:[%s3566_s1 + $0x1a0] ss:$20 sps:$4 sm:$0xff]  }
  0x2b   :  { %727 = vmatpush2.bf16.msra.mxu0 %v2476_v47  ;;  %v2543_v47 = vld [vmem:[%s3566_s1 + $0x60] ss:$20 sps:$4 sm:$0xff]  }
  0x2c   :  { %805 = vmatpush1.bf16.msra.mxu1 %v2473_v46  ;;  %728 = vmatprep.subr.bf16.mxu0 %v2477_v48  ;;  %v2556_v46 = vld [vmem:[%s3568_s3 + $0x94] ss:$12 sps:$4 sm:$0xff]   ;;  %v2554_v48 = vld [vmem:[%s3568_s3 + $0x90] ss:$12 sps:$4 sm:$0xff]  }
  0x2d   :  { %806 = vmatprep.subr.bf16.mxu1 %v2481_v49  ;;  %v2545_v49 = vld [vmem:[%s3566_s1 + $0x178] ss:$20 sps:$4 sm:$0xff]  }
  0x2f   :  { %729 = vmatpush2.bf16.msra.mxu0 %v2482_v53  ;;  %v2562_v53 = vld [vmem:[%s3568_s3 + $0x64] ss:$12 sps:$4 sm:$0xff]  }
  0x30   :  { %807 = vmatpush1.bf16.msra.mxu1 %v2479_v52  ;;  %730 = vmatprep.subr.bf16.mxu0 %v2483_v55  ;;  %v2557_v52 = vld [vmem:[%s3568_s3 + $0x78] ss:$12 sps:$4 sm:$0xff]   ;;  %v2560_v55 = vld [vmem:[%s3568_s3 + $0x60] ss:$12 sps:$4 sm:$0xff]  }
  0x31   :  { %808 = vmatprep.subr.bf16.mxu1 %v2487_v56  ;;  %v2565_v56 = vld [vmem:[%s3568_s3 + $0x22c] ss:$12 sps:$4 sm:$0xff]  }
  0x33   :  { %731 = vmatpush2.bf16.msra.mxu0 %v2488_v58  ;;  %v2563_v58 = vld [vmem:[%s3568_s3 + $0x228] ss:$12 sps:$4 sm:$0xff]  }
  0x34   :  { %809 = vmatpush2.bf16.msra.mxu1 %v2485_v57  ;;  %732 = vmatprep.subr.bf16.mxu0 %v2489_v59  ;;  %v2568_v57 = vld [vmem:[%s3568_s3 + $0x4c] ss:$12 sps:$4 sm:$0xff]   ;;  %v2566_v59 = vld [vmem:[%s3568_s3 + $0x48] ss:$12 sps:$4 sm:$0xff]  }
  0x35   :  { %810 = vmatprep.subr.bf16.mxu1 %v2493_v60  ;;  %v2571_v60 = vld [vmem:[%s3568_s3 + $0x214] ss:$12 sps:$4 sm:$0xff]  }
  0x37   :  { %733 = vmatpush2.bf16.msra.mxu0 %v2494_v62  ;;  %v2569_v62 = vld [vmem:[%s3568_s3 + $0x210] ss:$12 sps:$4 sm:$0xff]  }
  0x38   :  { %811 = vmatpush2.bf16.msra.mxu1 %v2491_v61  ;;  %734 = vmatprep.subr.bf16.mxu0 %v2495_v63  ;;  %v2574_v61 = vld [vmem:[%s3568_s3 + $0x34] ss:$12 sps:$4 sm:$0xff]   ;;  %v2572_v63 = vld [vmem:[%s3568_s3 + $0x30] ss:$12 sps:$4 sm:$0xff]  }
  0x39   :  { %812 = vmatprep.subr.bf16.mxu1 %v2499_v0  ;;  %v2577_v0 = vld [vmem:[%s3568_s3 + $0x1fc] ss:$12 sps:$4 sm:$0xff]  }
  0x3b   :  { %735 = vmatpush2.bf16.msra.mxu0 %v2500_v3  ;;  %v2575_v3 = vld [vmem:[%s3568_s3 + $0x1f8] ss:$12 sps:$4 sm:$0xff]  }
  0x3c   :  { %813 = vmatpush2.bf16.msra.mxu1 %v2497_v1  ;;  %736 = vmatprep.subr.bf16.mxu0 %v2501_v4  ;;  %v2580_v1 = vld [vmem:[%s3568_s3 + $0x1c] ss:$12 sps:$4 sm:$0xff]   ;;  %v2578_v4 = vld [vmem:[%s3568_s3 + $0x18] ss:$12 sps:$4 sm:$0xff]  }
  0x3d   :  { %814 = vmatprep.subr.bf16.mxu1 %v2505_v5  ;;  %v2583_v5 = vld [vmem:[%s3568_s3 + $0x1e4] ss:$12 sps:$4 sm:$0xff]  }
  0x3f   :  { %737 = vmatpush2.bf16.msra.mxu0 %v2506_v7  ;;  %v2581_v7 = vld [vmem:[%s3568_s3 + $0x1e0] ss:$12 sps:$4 sm:$0xff]  }
  0x40   :  { %815 = vmatpush2.bf16.msra.mxu1 %v2503_v6  ;;  %843 = vmatprep.subr.bf16.mxu0 %v2512_v11  ;;  %v2586_v6 = vld [vmem:[%s3568_s3 + $0x4] ss:$12 sps:$4 sm:$0xff]   ;;  %v2587_v11 = vld [vmem:[%s3568_s3 + $0x1c8] ss:$12 sps:$4 sm:$0xff]  }
  0x41   :  { %816 = vmatprep.subr.bf16.mxu1 %v2509_v10  ;;  %v2592_v10 = vld [vmem:[%s3568_s3 + $0x16c] ss:$12 sps:$4 sm:$0xff]  }
  0x42   :  { %739 = vmatmul.mubr.bf16.vlgmr.msra.gmra.mxu0 %v3008_v13 }
  0x43   :  { %844 = vmatpush1.bf16.msra.mxu0 %v2510_v14  ;;  %867 = vmatprep.mubr.bf16.mxu0 %v2739_v2  ;;  %v2598_v14 = vld [vmem:[%s3568_s3 + $0x154] ss:$12 sps:$4 sm:$0xff]  }
  0x44   :  { %817 = vmatpush2.bf16.msra.mxu1 %v2507_v12  ;;  %845 = vmatprep.subr.bf16.mxu0 %v2518_v16  ;;  %v2590_v12 = vld [vmem:[%s3568_s3 + $0x168] ss:$12 sps:$4 sm:$0xff]   ;;  %v2596_v16 = vld [vmem:[%s3568_s3 + $0x150] ss:$12 sps:$4 sm:$0xff]  }
  0x45   :  { %818 = vmatprep.subr.bf16.mxu1 %v2515_v15  ;;  %v2593_v15 = vld [vmem:[%s3568_s3 + $0x1b0] ss:$12 sps:$4 sm:$0xff]  }
  0x47   :  { %846 = vmatpush1.bf16.msra.mxu0 %v2516_v18  ;;  %v2604_v18 = vld [vmem:[%s3568_s3 + $0x13c] ss:$12 sps:$4 sm:$0xff]  }
  0x48   :  { %819 = vmatpush2.bf16.msra.mxu1 %v2513_v17  ;;  %847 = vmatprep.subr.bf16.mxu0 %v2524_v20  ;;  %v2601_v17 = vld [vmem:[%s3568_s3 + $0x19c] ss:$12 sps:$4 sm:$0xff]   ;;  %v2602_v20 = vld [vmem:[%s3568_s3 + $0x138] ss:$12 sps:$4 sm:$0xff]  }
  0x49   :  { %820 = vmatprep.subr.bf16.mxu1 %v2521_v19  ;;  %v2599_v19 = vld [vmem:[%s3568_s3 + $0x198] ss:$12 sps:$4 sm:$0xff]  }
  0x4b   :  { %848 = vmatpush1.bf16.msra.mxu0 %v2522_v23  ;;  %v2610_v23 = vld [vmem:[%s3568_s3 + $0x124] ss:$12 sps:$4 sm:$0xff]  }
  0x4c   :  { %821 = vmatpush2.bf16.msra.mxu1 %v2519_v21  ;;  %849 = vmatprep.subr.bf16.mxu0 %v2530_v25  ;;  %v2607_v21 = vld [vmem:[%s3568_s3 + $0x184] ss:$12 sps:$4 sm:$0xff]   ;;  %v2608_v25 = vld [vmem:[%s3568_s3 + $0x120] ss:$12 sps:$4 sm:$0xff]  }
  0x4d   :  { %822 = vmatprep.subr.bf16.mxu1 %v2527_v24  ;;  %v2605_v24 = vld [vmem:[%s3568_s3 + $0x180] ss:$12 sps:$4 sm:$0xff]  }
  0x4f   :  { %850 = vmatpush1.bf16.msra.mxu0 %v2528_v27  ;;  %v2616_v27 = vld [vmem:[%s3568_s3 + $0x10c] ss:$12 sps:$4 sm:$0xff]  }
  0x50   :  { %823 = vmatpush2.bf16.msra.mxu1 %v2525_v26  ;;  %2293 = vmatprep.subr.bf16.mxu0 %v2531_v28  ;;  %v2613_v26 = vld [vmem:[%s3568_s3 + $0x2ec] ss:$12 sps:$4 sm:$0xff]   ;;  %v2611_v28 = vld [vmem:[%s3568_s3 + $0x2e8] ss:$12 sps:$4 sm:$0xff]  }
  0x51   :  { %2373 = vmatprep.subr.bf16.mxu1 %v2740_v32 }
  0x52   :  { %2171 = vmatmul.mubr.msk.bf16.vlgmr.msra.gmra.mxu0 %vm702_vm0, %v2844_v22 }
  0x53   :  { %825 = vmatmul.mubr.bf16.vlgmr.msra.gmra.mxu1 %v3008_v13  ;;  %2294 = vmatpush3.bf16.msra.mxu0 %v2532_v29  ;;  %v2614_v29 = vld [vmem:[%s3568_s3 + $0x108] ss:$12 sps:$4 sm:$0xff]  }
  0x54   :  { %2374 = vmatpush3.bf16.msra.mxu1 %v2541_v30  ;;  %2295 = vmatprep.subr.bf16.mxu0 %v2533_v31  ;;  %v2619_v30 = vld [vmem:[%s3568_s3 + $0x2d4] ss:$12 sps:$4 sm:$0xff]  }
  0x55   :  { %2375 = vmatprep.subr.bf16.mxu1 %v2740_v32  ;;  %910 = vmatprep.mubr.bf16.mxu0 %v2941_v54  ;;  %v2549_v54 = vld [vmem:[%s3566_s1 + $0x10] ss:$20 sps:$4 sm:$0xff]   ;;  %v2622_v31 = vld [vmem:[%s3568_s3 + $0xf4] ss:$12 sps:$4 sm:$0xff]  }
  0x56   :  { %2381 = vmatprep.mubr.msk.bf16.mxu1 %vm2741_vm1, %v2740_v32 }
  0x57   :  { %2296 = vmatpush3.bf16.msra.mxu0 %v2534_v33  ;;  %v2617_v33 = vld [vmem:[%s3568_s3 + $0x2d0] ss:$12 sps:$4 sm:$0xff]  }
  0x58   :  { %2376 = vmatpush3.bf16.msra.mxu1 %v2544_v35  ;;  %2297 = vmatprep.subr.bf16.mxu0 %v2535_v34  ;;  %v2620_v34 = vld [vmem:[%s3568_s3 + $0xf0] ss:$12 sps:$4 sm:$0xff]  }
  0x59   :  { %2377 = vmatprep.subr.bf16.mxu1 %v2740_v32  ;;  %v2625_v35 = vld [vmem:[%s3568_s3 + $0x2bc] ss:$12 sps:$4 sm:$0xff]  }
  0x5b   :  { %2298 = vmatpush3.bf16.msra.mxu0 %v2536_v36  ;;  %v2628_v36 = vld [vmem:[%s3568_s3 + $0xdc] ss:$12 sps:$4 sm:$0xff]  }
  0x5c   :  { %2378 = vmatpush3.bf16.msra.mxu1 %v2547_v37  ;;  %2299 = vmatprep.subr.bf16.mxu0 %v2537_v38 }
  0x5d   :  { %2379 = vmatprep.subr.bf16.mxu1 %v2740_v32 }
  0x5f   :  { %2300 = vmatpush3.bf16.msra.mxu0 %v2538_v39 }
  0x60   :  { %2380 = vmatpush3.bf16.msra.mxu1 %v2550_v40  ;;  %2301 = vmatprep.subr.bf16.mxu0 %v2539_v41 }
  0x61   :  { %1782 = vmatprep.subr.bf16.mxu1 %v2553_v42 }
  0x63   :  { %2382 = vmatmul.mubr.msk.bf16.vlgmr.msra.gmra.mxu1 %vm702_vm0, %v2844_v22  ;;  %2302 = vmatpush3.bf16.msra.mxu0 %v2540_v43  ;;  %v2559_v22 = vld [vmem:[%s3568_s3 + $0x7c] ss:$12 sps:$4 sm:$0xff]  }
  0x64   :  { %1783 = vmatpush1.bf16.msra.mxu1 %v2551_v44  ;;  %2303 = vmatprep.subr.bf16.mxu0 %v2542_v45 }
  0x65   :  { %1784 = vmatprep.subr.bf16.mxu1 %v2556_v46 }
  0x67   :  { %2304 = vmatpush3.bf16.msra.mxu0 %v2543_v47 }
  0x68   :  { %1785 = vmatpush1.bf16.msra.mxu1 %v2554_v48  ;;  %2305 = vmatprep.subr.bf16.mxu0 %v2545_v49 }
  0x69   :  { %1786 = vmatprep.subr.bf16.mxu1 %v2559_v22 }
  0x6b   :  { %2306 = vmatpush3.bf16.msra.mxu0 %v2546_v50 }
  0x6c   :  { %1787 = vmatpush1.bf16.msra.mxu1 %v2557_v52  ;;  %2307 = vmatprep.subr.bf16.mxu0 %v2548_v51 }
  0x6d   :  { %1788 = vmatprep.subr.bf16.mxu1 %v2562_v53 }
  0x6f   :  { %2308 = vmatpush3.bf16.msra.mxu0 %v2549_v54 }
  0x70   :  { %1789 = vmatpush1.bf16.msra.mxu1 %v2560_v55  ;;  %1825 = vmatprep.subr.bf16.mxu0 %v2565_v56 }
  0x71   :  { %1790 = vmatprep.subr.bf16.mxu1 %v2568_v57 }
  0x72   :  { %911 = vmatmul.mubr.bf16.vlgmr.msra.gmra.mxu0 %v3008_v13  ;;  %v2595_v13 = vld [vmem:[%s3568_s3 + $0x1b4] ss:$12 sps:$4 sm:$0xff]  }
  0x73   :  { %1826 = vmatpush1.bf16.msra.mxu0 %v2563_v58 }
  0x74   :  { %1791 = vmatpush1.bf16.msra.mxu1 %v2566_v59  ;;  %1827 = vmatprep.subr.bf16.mxu0 %v2571_v60 }
  0x75   :  { %1792 = vmatprep.subr.bf16.mxu1 %v2574_v61 }
  0x77   :  { %1828 = vmatpush1.bf16.msra.mxu0 %v2569_v62 }
  0x78   :  { %1793 = vmatpush1.bf16.msra.mxu1 %v2572_v63  ;;  %1829 = vmatprep.subr.bf16.mxu0 %v2577_v0 }
  0x79   :  { %1794 = vmatprep.subr.bf16.mxu1 %v2580_v1 }
  0x7b   :  { %1830 = vmatpush1.bf16.msra.mxu0 %v2575_v3 }
  0x7c   :  { %1795 = vmatpush1.bf16.msra.mxu1 %v2578_v4  ;;  %1831 = vmatprep.subr.bf16.mxu0 %v2583_v5 }
  0x7d   :  { %1796 = vmatprep.subr.bf16.mxu1 %v2586_v6 }
  0x7f   :  { %1832 = vmatpush1.bf16.msra.mxu0 %v2581_v7 }
  0x80   :  { %1797 = vmatpush1.bf16.msra.mxu1 %v2584_v8  ;;  %1833 = vmatprep.subr.bf16.mxu0 %v2589_v9 }
  0x81   :  { %1798 = vmatprep.subr.bf16.mxu1 %v2592_v10 }
  0x83   :  { %1834 = vmatpush1.bf16.msra.mxu0 %v2587_v11 }
  0x84   :  { %1799 = vmatpush2.bf16.msra.mxu1 %v2590_v12  ;;  %1835 = vmatprep.subr.bf16.mxu0 %v2595_v13 }
  0x85   :  { %1800 = vmatprep.subr.bf16.mxu1 %v2598_v14 }
  0x87   :  { %1836 = vmatpush1.bf16.msra.mxu0 %v2593_v15 }
  0x88   :  { %1801 = vmatpush2.bf16.msra.mxu1 %v2596_v16  ;;  %1837 = vmatprep.subr.bf16.mxu0 %v2601_v17 }
  0x89   :  { %1802 = vmatprep.subr.bf16.mxu1 %v2604_v18 }
  0x8b   :  { %1838 = vmatpush1.bf16.msra.mxu0 %v2599_v19 }
  0x8c   :  { %1803 = vmatpush2.bf16.msra.mxu1 %v2602_v20  ;;  %1839 = vmatprep.subr.bf16.mxu0 %v2607_v21 }
  0x8d   :  { %1804 = vmatprep.subr.bf16.mxu1 %v2610_v23 }
  0x8f   :  { %1840 = vmatpush1.bf16.msra.mxu0 %v2605_v24 }
  0x90   :  { %1805 = vmatpush2.bf16.msra.mxu1 %v2608_v25  ;;  %1841 = vmatprep.subr.bf16.mxu0 %v2613_v26 }
  0x91   :  { %1806 = vmatprep.subr.bf16.mxu1 %v2616_v27 }
  0x93   :  { %1842 = vmatpush2.bf16.msra.mxu0 %v2611_v28 }
  0x94   :  { %1807 = vmatpush2.bf16.msra.mxu1 %v2614_v29  ;;  %1843 = vmatprep.subr.bf16.mxu0 %v2619_v30 }
  0x95   :  { %1808 = vmatprep.subr.bf16.mxu1 %v2622_v31 }
  0x96   :  { %12 = vsyncpa [#allocation4], 0  ;;  %v2623_v37 = vld [vmem:[%s3568_s3 + $0x2b8] ss:$12 sps:$4 sm:$0xff]   ;;  %v2629_v41 = vld [vmem:[%s3568_s3 + $0x2a0] ss:$12 sps:$4 sm:$0xff]   ;;  %v157_v52 = vlaneseq }
  0x97   :  { %1844 = vmatpush2.bf16.msra.mxu0 %v2617_v33  ;;  %v2626_v38 = vld [vmem:[%s3568_s3 + $0xd8] ss:$12 sps:$4 sm:$0xff]   ;;  %v2632_v42 = vld [vmem:[%s3568_s3 + $0xc0] ss:$12 sps:$4 sm:$0xff]   ;;  %v2635_v45 = vld [vmem:[%s3568_s3 + $0x288] ss:$12 sps:$4 sm:$0xff]  }
  0x98   :  { %1809 = vmatpush2.bf16.msra.mxu1 %v2620_v34  ;;  %1845 = vmatprep.subr.bf16.mxu0 %v2625_v35  ;;  %v2631_v39 = vld [vmem:[%s3568_s3 + $0x2a4] ss:$12 sps:$4 sm:$0xff]   ;;  %v2637_v43 = vld [vmem:[%s3568_s3 + $0x28c] ss:$12 sps:$4 sm:$0xff]   ;;  %v2640_v46 = vld [vmem:[%s3568_s3 + $0x274] ss:$12 sps:$4 sm:$0xff]  }
  0x99   :  { %1810 = vmatprep.subr.bf16.mxu1 %v2628_v36  ;;  %v2634_v40 = vld [vmem:[%s3568_s3 + $0xc4] ss:$12 sps:$4 sm:$0xff]   ;;  %v2650_v44 = vld [vmem:[%s3568_s3 + $0x3ac] ss:$12 sps:$4 sm:$0xff]   ;;  %v2643_v48 = vld [vmem:[%s3568_s3 + $0x25c] ss:$12 sps:$4 sm:$0xff]  }
  0x9a   :  { %v2638_v47 = vld [vmem:[%s3568_s3 + $0x270] ss:$12 sps:$4 sm:$0xff]   ;;  %v2641_v49 = vld [vmem:[%s3568_s3 + $0x258] ss:$12 sps:$4 sm:$0xff]   ;;  %v2644_v50 = vld [vmem:[%s3568_s3 + $0x240] ss:$12 sps:$4 sm:$0xff]  }
  0x9b   :  { %1846 = vmatpush2.bf16.msra.mxu0 %v2623_v37  ;;  %v2646_v22 = vld [vmem:[%s3568_s3 + $0x244] ss:$12 sps:$4 sm:$0xff]   ;;  %v3322_v53 = vshrl.u32 %v157_v52, 7  ;;  %v2648_v13 = vld [vmem:[%s3568_s3 + $0x3a8] ss:$12 sps:$4 sm:$0xff]   ;;  %s2742_s15 = smov [#allocation3]  }
  0x9c   :  { %1811 = vmatpush2.bf16.msra.mxu1 %v2626_v38  ;;  %1847 = vmatprep.subr.bf16.mxu0 %v2631_v39  ;;  %v2647_v51 = vld [vmem:[%s3568_s3 + $0x170] ss:$12 sps:$4 sm:$0xff]   ;;  %v3329_v57 = vld [vmem:[%s3567_s2] sm:$0x1f]  ;;  %v2670_v39 = vld [vmem:[%s3568_s3 + $0x34c] ss:$12 sps:$4 sm:$0xff]  }
  0x9d   :  { %1812 = vmatprep.subr.bf16.mxu1 %v2634_v40  ;;  %v163_v55 = vsub.s32 1, %v3322_v53  ;;  %v159_v56 = vsub.s32 0, %v3322_v53  ;;  %v2655_v15 = vld [vmem:[%s3568_s3 + $0x394] ss:$12 sps:$4 sm:$0xff]   ;;  %v171_v16 = vsub.s32 3, %v3322_v53  ;;  %v167_v17 = vsub.s32 2, %v3322_v53 }
  0x9e   :  { %v2653_v18 = vld [vmem:[%s3568_s3 + $0x390] ss:$12 sps:$4 sm:$0xff]   ;;  %v2663_v36 = vld [vmem:[%s3568_s3 + $0x360] ss:$12 sps:$4 sm:$0xff]   ;;  %s2059_s16 = sshll.u32 %s2742_s15, 4  ;;  %s2060_s16 = int_to_ptr.vmem [resolvable:$true] %s2059_s16 }
  0x9f   :  { %1848 = vmatpush2.bf16.msra.mxu0 %v2629_v41  ;;  %v164_v60 = vrot.slane %v3329_v57, %v163_v55  ;;  %v160_v61 = vrot.slane %v3329_v57, %v159_v56  ;;  %v2660_v21 = vld [vmem:[%s3568_s3 + $0x37c] ss:$12 sps:$4 sm:$0xff]   ;;  %v172_v23 = vrot.slane %v3329_v57, %v171_v16  ;;  %v168_v24 = vrot.slane %v3329_v57, %v167_v17  ;;  %v2665_v29 = vld [vmem:[%s3568_s3 + $0x364] ss:$12 sps:$4 sm:$0xff]   ;;  %s2717_s19 = scalar_lea.vmem %s2060_s16, 768  ;;  %p2722_p1 = scmp.lt.s32.totalorder %s2060_s16, %s2060_s16 }
  0xa0   :  { %1813 = vmatpush2.bf16.msra.mxu1 %v2632_v42  ;;  %1849 = vmatprep.subr.bf16.mxu0 %v2637_v43  ;;  %v2680_v52 = vld [vmem:[%s3568_s3 + $0x31c] ss:$12 sps:$4 sm:$0xff]   ;;  %p2718_p0 = scmp.ne.s32.totalorder %s2060_s16, %s2717_s19  ;;  %p2723_p2 = scmp.lt.s32.totalorder %s2717_s19, %s2717_s19 }
  0xa1   :  { %1868 = vmatprep.subr.bf16.mxu1 %v2650_v44  ;;  %v2651_v44 = vld [vmem:[%s3568_s3 + $0xb0] ss:$12 sps:$4 sm:$0xff]  }
  0xa2   :  { %p2724_p3 = por %p2723_p2, %p2722_p1 }
  0xa3   :  { %1850 = vmatpush2.bf16.msra.mxu0 %v2635_v45 }
  0xa4   :  { %1851 = vmatprep.subr.bf16.mxu0 %v2640_v46  ;;  %v2652_v46 = vld [vmem:[%s3568_s3 + $0x158] ss:$12 sps:$4 sm:$0xff]   ;;  %p2725_p4 = pnand %p2724_p3, %p2718_p0 }
  0xa7   :  { %1852 = vmatpush2.bf16.msra.mxu0 %v2638_v47  ;;  %v2668_v47 = vld [vmem:[%s3568_s3 + $0x348] ss:$12 sps:$4 sm:$0xff]  }
  0xa8   :  { %1853 = vmatprep.subr.bf16.mxu0 %v2643_v48  ;;  %v2675_v48 = vld [vmem:[%s3568_s3 + $0x334] ss:$12 sps:$4 sm:$0xff]  }
  0xab   :  { %1854 = vmatpush2.bf16.msra.mxu0 %v2641_v49  ;;  %v2656_v49 = vld [vmem:[%s3568_s3 + $0x98] ss:$12 sps:$4 sm:$0xff]  }
  0xac   :  { %1855 = vmatprep.subr.bf16.mxu0 %v2646_v22  ;;  %v2657_v22 = vld [vmem:[%s3568_s3 + $0x140] ss:$12 sps:$4 sm:$0xff]  }
  0xaf   :  { %1856 = vmatpush2.bf16.msra.mxu0 %v2644_v50 }
  0xb0   :  { %2320 = vmatprep.subr.bf16.mxu0 %v2647_v51  ;;  %v2673_v51 = vld [vmem:[%s3568_s3 + $0x330] ss:$12 sps:$4 sm:$0xff]  }
  0xd3   :  { %v783_v54 = vpop.f32.mrf.mxu1 }
  0xd5   :  { %v785_v58 = vpop.f32.mrf.mxu1 }
  0xd7   :  { %v787_v63 = vpop.f32.mrf.mxu1 }
  0xd9   :  { %v789_v7 = vpop.f32.mrf.mxu1 }
 0x102   :  { %v740_v59 = vpop.f32.mrf.mxu0 }
 0x103   :  { %v741_v4 = vadd.f32 %v740_v59, %v160_v61  ;;  %v2662_v59 = vld [vmem:[%s3568_s3 + $0x128] ss:$12 sps:$4 sm:$0xff]  }
 0x104   :  { %v742_v62 = vpop.f32.mrf.mxu0 }
 0x105   :  { %v743_v1 = vadd.f32 %v742_v62, %v164_v60  ;;  %v784_v11 = vadd.f32 %v783_v54, %v741_v4  ;;  %v2685_v62 = vld [vmem:[%s3568_s3 + $0x304] ss:$12 sps:$4 sm:$0xff]  }
 0x106   :  { %v744_v0 = vpop.f32.mrf.mxu0  ;;  %v2687_v4 = vld [vmem:[%s3568_s3 + $0x2f0] ss:$12 sps:$4 sm:$0xff]  }
 0x107   :  { %v745_v3 = vadd.f32 %v744_v0, %v160_v61  ;;  %v786_v9 = vadd.f32 %v785_v58, %v743_v1  ;;  %v2661_v58 = vld [vmem:[%s3568_s3 + $0x80] ss:$12 sps:$4 sm:$0xff]   ;;  %v2678_v61 = vld [vmem:[%s3568_s3 + $0x318] ss:$12 sps:$4 sm:$0xff]   ;;  %v2666_v0 = vld [vmem:[%s3568_s3 + $0x68] ss:$12 sps:$4 sm:$0xff]  }
 0x108   :  { %v746_v5 = vpop.f32.mrf.mxu0  ;;  %v2667_v1 = vld [vmem:[%s3568_s3 + $0x110] ss:$12 sps:$4 sm:$0xff]  }
 0x109   :  { %v747_v6 = vadd.f32 %v746_v5, %v164_v60  ;;  %v788_v8 = vadd.f32 %v787_v63, %v745_v3  ;;  %v2683_v3 = vld [vmem:[%s3568_s3 + $0x300] ss:$12 sps:$4 sm:$0xff]   ;;  %v2671_v5 = vld [vmem:[%s3568_s3 + $0x50] ss:$12 sps:$4 sm:$0xff]  }
 0x10b   :  { %v790_v10 = vadd.f32 %v789_v7, %v747_v6  ;;  %v3340_v14 = vpack.c.bf16 %v788_v8, %v784_v11  ;;  %v2672_v6 = vld [vmem:[%s3568_s3 + $0xf8] ss:$12 sps:$4 sm:$0xff]   ;;  %v175_v7 = vsub.s32 4, %v3322_v53  ;;  %v2715_v53 = vld [vmem:[%s3565_s0 + $0x10] sm:$0xff] }
 0x10c   :  { %v2676_v8 = vld [vmem:[%s3568_s3 + $0x38] ss:$12 sps:$4 sm:$0xff]  }
 0x10d   :  { %v961_v12 = vpack.c.bf16 %v790_v10, %v786_v9  ;;  %v2677_v10 = vld [vmem:[%s3568_s3 + $0xe0] ss:$12 sps:$4 sm:$0xff]  }
 0x10f   :  { %1814 = vmatprep.mubr.bf16.mxu1 %v961_v12 }
 0x110   :  { %1815 = vmatmul.mubr.bf16.vlgmr.msra.gmra.mxu1 %v3340_v14 }
 0x111   :  { %1869 = vmatpush1.bf16.msra.mxu1 %v2648_v13  ;;  %1900 = vmatprep.mubr.bf16.mxu1 %v2739_v2  ;;  %v2658_v2 = vld [vmem:[%s3568_s3 + $0x378] ss:$12 sps:$4 sm:$0xff]  }
 0x112   :  { %v869_v20 = vpop.f32.mrf.mxu0  ;;  %1870 = vmatprep.subr.bf16.mxu1 %v2655_v15  ;;  %v2681_v15 = vld [vmem:[%s3568_s3 + $0x20] ss:$12 sps:$4 sm:$0xff]  }
 0x113   :  { %v826_v19 = vpop.f32.mrf.mxu1 }
 0x114   :  { %v871_v26 = vpop.f32.mrf.mxu0  ;;  %v827_v33 = vadd.f32 %v826_v19, %v168_v24 }
 0x115   :  { %v828_v25 = vpop.f32.mrf.mxu1  ;;  %1871 = vmatpush1.bf16.msra.mxu1 %v2653_v18  ;;  %v2682_v18 = vld [vmem:[%s3568_s3 + $0xc8] ss:$12 sps:$4 sm:$0xff]  }
 0x116   :  { %v873_v28 = vpop.f32.mrf.mxu0  ;;  %1872 = vmatprep.subr.bf16.mxu1 %v2660_v21  ;;  %v829_v30 = vadd.f32 %v828_v25, %v172_v23  ;;  %v870_v42 = vadd.f32 %v869_v20, %v827_v33  ;;  %v2695_v33 = vld [vmem:[%s3568_s3 + $0x200] ss:$12 sps:$4 sm:$0xff]  }
 0x117   :  { %v830_v27 = vpop.f32.mrf.mxu1 }
 0x118   :  { %v831_v31 = vadd.f32 %v830_v27, %v168_v24  ;;  %v875_v38 = vpop.f32.mrf.mxu0  ;;  %v872_v40 = vadd.f32 %v871_v26, %v829_v30  ;;  %v2688_v26 = vld [vmem:[%s3568_s3 + $0x3b0] ss:$12 sps:$4 sm:$0xff]   ;;  %v2692_v30 = vld [vmem:[%s3568_s3 + $0x218] ss:$12 sps:$4 sm:$0xff]  }
 0x119   :  { %v832_v34 = vpop.f32.mrf.mxu1  ;;  %1873 = vmatpush1.bf16.msra.mxu1 %v2658_v2  ;;  %v2689_v2 = vld [vmem:[%s3568_s3 + $0x230] ss:$12 sps:$4 sm:$0xff]  }
 0x11a   :  { %v833_v35 = vadd.f32 %v832_v34, %v172_v23  ;;  %v874_v37 = vadd.f32 %v873_v28, %v831_v31  ;;  %1874 = vmatprep.subr.bf16.mxu1 %v2665_v29  ;;  %v2690_v28 = vld [vmem:[%s3568_s3 + $0x2d8] ss:$12 sps:$4 sm:$0xff]   ;;  %v2694_v31 = vld [vmem:[%s3568_s3 + $0x380] ss:$12 sps:$4 sm:$0xff]   ;;  %v2696_v34 = vld [vmem:[%s3568_s3 + $0x2a8] ss:$12 sps:$4 sm:$0xff]  }
 0x11b   :  { %v2691_v29 = vld [vmem:[%s3568_s3 + $0x398] ss:$12 sps:$4 sm:$0xff]  }
 0x11c   :  { %v876_v41 = vadd.f32 %v875_v38, %v833_v35  ;;  %v3376_v45 = vpack.c.bf16 %v874_v37, %v870_v42  ;;  %v2697_v35 = vld [vmem:[%s3568_s3 + $0x368] ss:$12 sps:$4 sm:$0xff]   ;;  %v2699_v37 = vld [vmem:[%s3568_s3 + $0x290] ss:$12 sps:$4 sm:$0xff]   ;;  %v2704_v42 = vld [vmem:[%s3568_s3 + $0x1b8] ss:$12 sps:$4 sm:$0xff]  }
 0x11d   :  { %1875 = vmatpush1.bf16.msra.mxu1 %v2663_v36  ;;  %v2698_v36 = vld [vmem:[%s3568_s3 + $0x1e8] ss:$12 sps:$4 sm:$0xff]   ;;  %v2700_v38 = vld [vmem:[%s3568_s3 + $0x350] ss:$12 sps:$4 sm:$0xff]  }
 0x11e   :  { %v3371_v43 = vpack.c.bf16 %v876_v41, %v872_v40  ;;  %1876 = vmatprep.subr.bf16.mxu1 %v2670_v39  ;;  %v2701_v39 = vld [vmem:[%s3568_s3 + $0x1d0] ss:$12 sps:$4 sm:$0xff]   ;;  %v2702_v40 = vld [vmem:[%s3568_s3 + $0x278] ss:$12 sps:$4 sm:$0xff]  }
 0x11f   :  { %v2703_v41 = vld [vmem:[%s3568_s3 + $0x338] ss:$12 sps:$4 sm:$0xff]  }
 0x120   :  { %1857 = vmatprep.mubr.bf16.mxu0 %v3371_v43 }
 0x121   :  { %1858 = vmatmul.mubr.bf16.vlgmr.msra.gmra.mxu0 %v3376_v45  ;;  %1877 = vmatpush1.bf16.msra.mxu1 %v2668_v47  ;;  %v2708_v47 = vld [vmem:[%s3568_s3 + $0x248] ss:$12 sps:$4 sm:$0xff]  }
 0x122   :  { %2321 = vmatpush3.bf16.msra.mxu0 %v2651_v44  ;;  %1943 = vmatprep.mubr.bf16.mxu0 %v961_v12  ;;  %v176_v12 = vrot.slane %v3329_v57, %v175_v7  ;;  %v2686_v57 = vld [vmem:[%s3568_s3 + $0x8] ss:$12 sps:$4 sm:$0xff]   ;;  %v2706_v44 = vld [vmem:[%s3568_s3 + $0x320] ss:$12 sps:$4 sm:$0xff]  }
 0x123   :  { %2322 = vmatprep.subr.bf16.mxu0 %v2652_v46  ;;  %v953_v50 = vpop.f32.mrf.mxu1  ;;  %1878 = vmatprep.subr.bf16.mxu1 %v2675_v48  ;;  %v2707_v46 = vld [vmem:[%s3568_s3 + $0x1a0] ss:$12 sps:$4 sm:$0xff]   ;;  %v2709_v48 = vld [vmem:[%s3568_s3 + $0x308] ss:$12 sps:$4 sm:$0xff]  }
 0x125   :  { %v2383_v54 = vpop.f32.mrf.mxu1  ;;  %1879 = vmatpush1.bf16.msra.mxu1 %v2673_v51 }
 0x126   :  { %2323 = vmatpush3.bf16.msra.mxu0 %v2656_v49  ;;  %1880 = vmatprep.subr.bf16.mxu1 %v2680_v52  ;;  %v2710_v49 = vld [vmem:[%s3568_s3 + $0x188] ss:$12 sps:$4 sm:$0xff]  }
 0x127   :  { %2324 = vmatprep.subr.bf16.mxu0 %v2657_v22  ;;  %v956_v60 = vpop.f32.mrf.mxu1 }
 0x129   :  { %v2384_v63 = vpop.f32.mrf.mxu1  ;;  %1881 = vmatpush1.bf16.msra.mxu1 %v2678_v61 }
 0x12a   :  { %2325 = vmatpush3.bf16.msra.mxu0 %v2661_v58  ;;  %1882 = vmatprep.subr.bf16.mxu1 %v2685_v62 }
 0x12b   :  { %2326 = vmatprep.subr.bf16.mxu0 %v2662_v59 }
 0x12d   :  { %1883 = vmatpush1.bf16.msra.mxu1 %v2683_v3 }
 0x12e   :  { %2327 = vmatpush3.bf16.msra.mxu0 %v2666_v0  ;;  %2342 = vmatprep.subr.bf16.mxu1 %v2687_v4 }
 0x12f   :  { %2328 = vmatprep.subr.bf16.mxu0 %v2667_v1  ;;  %v2035_v1 = vstv %s3570_s5 }
 0x132   :  { %2329 = vmatpush3.bf16.msra.mxu0 %v2671_v5  ;;  %v2309_v9 = vpop.f32.mrf.mxu0 }
 0x133   :  { %2330 = vmatprep.subr.bf16.mxu0 %v2672_v6 }
 0x134   :  { %v2310_v11 = vpop.f32.mrf.mxu0 }
 0x135   :  { %v2311_v13 = vadd.f32 %v2310_v11, %v2309_v9 }
 0x136   :  { %2331 = vmatpush3.bf16.msra.mxu0 %v2676_v8  ;;  %v2312_v16 = vpop.f32.mrf.mxu0 }
 0x137   :  { %2332 = vmatprep.subr.bf16.mxu0 %v2677_v10  ;;  %v913_v20 = vadd.f32 %v2311_v13, %v176_v12 }
 0x138   :  { %v2313_v19 = vpop.f32.mrf.mxu0 }
 0x139   :  { %v2314_v21 = vadd.f32 %v2313_v19, %v2312_v16  ;;  %v954_v24 = vadd.f32 %v953_v50, %v913_v20  ;;  %v1125_v50 = vld [vmem:[%s3569_s4] sm:$0x7]  ;;  %v2712_v19 = vld [vmem:[%s3565_s0 + $0x8] sm:$0xff] }
 0x13a   :  { %2333 = vmatpush3.bf16.msra.mxu0 %v2681_v15  ;;  %v1134_v59 = vrot.slane %v1125_v50, %v163_v55 }
 0x13b   :  { %2334 = vmatprep.subr.bf16.mxu0 %v2682_v18  ;;  %v916_v23 = vadd.f32 %v2314_v21, %v176_v12  ;;  %v2711_v12 = vld [vmem:[%s3565_s0] sm:$0xff] }
 0x13d   :  { %v957_v25 = vadd.f32 %v956_v60, %v916_v23  ;;  %v2713_v23 = vld [vmem:[%s3565_s0 + $0x18] sm:$0xff] }
 0x13e   :  { %2335 = vmatpush3.bf16.msra.mxu0 %v2686_v57 }
 0x13f   :  { %2385 = vmatprep.subr.bf16.mxu0 %v2740_v32  ;;  %v964_v27 = vpack.c.bf16 %v957_v25, %v954_v24 }
 0x141   :  { %1944 = vmatmul.mubr.bf16.vlgmr.msra.gmra.mxu0 %v3340_v14  ;;  %1901 = vmatmul.mubr.bf16.vlgmr.msra.gmra.mxu1 %v964_v27  ;;  %v2693_v14 = vld [vmem:[%s3568_s3 + $0x2c0] ss:$12 sps:$4 sm:$0xff]  }
 0x142   :  { %2386 = vmatpush3.bf16.msra.mxu0 %v2688_v26  ;;  %2343 = vmatpush3.bf16.msra.mxu1 %v2689_v2  ;;  %v2714_v26 = vld [vmem:[%s3565_s0 + $0x20] sm:$0xff] }
 0x143   :  { %1984 = vmatprep.mubr.bf16.mxu1 %v3371_v43  ;;  %2387 = vmatprep.subr.bf16.mxu0 %v2740_v32  ;;  %v2705_v43 = vld [vmem:[%s3568_s3 + $0x260] ss:$12 sps:$4 sm:$0xff]  }
 0x144   :  { %2344 = vmatprep.subr.bf16.mxu1 %v2690_v28  ;;  %2401 = vmatprep.mubr.msk.bf16.mxu0 %vm2741_vm1, %v2740_v32 }
 0x146   :  { %2388 = vmatpush3.bf16.msra.mxu0 %v2691_v29  ;;  %2345 = vmatpush3.bf16.msra.mxu1 %v2692_v30 }
 0x147   :  { %2389 = vmatprep.subr.bf16.mxu0 %v2740_v32  ;;  %2346 = vmatprep.subr.bf16.mxu1 %v2693_v14  ;;  %v1138_v14 = vrot.slane %v1125_v50, %v167_v17 }
 0x14a   :  { %2390 = vmatpush3.bf16.msra.mxu0 %v2694_v31  ;;  %2347 = vmatpush3.bf16.msra.mxu1 %v2695_v33 }
 0x14b   :  { %2391 = vmatprep.subr.bf16.mxu0 %v2740_v32  ;;  %2348 = vmatprep.subr.bf16.mxu1 %v2696_v34 }
 0x14e   :  { %2392 = vmatpush3.bf16.msra.mxu0 %v2697_v35  ;;  %2349 = vmatpush3.bf16.msra.mxu1 %v2698_v36 }
 0x14f   :  { %2393 = vmatprep.subr.bf16.mxu0 %v2740_v32  ;;  %2350 = vmatprep.subr.bf16.mxu1 %v2699_v37 }
 0x152   :  { %2394 = vmatpush3.bf16.msra.mxu0 %v2700_v38  ;;  %2351 = vmatpush3.bf16.msra.mxu1 %v2701_v39 }
 0x153   :  { %2395 = vmatprep.subr.bf16.mxu0 %v2740_v32  ;;  %2352 = vmatprep.subr.bf16.mxu1 %v2702_v40 }
 0x156   :  { %2396 = vmatpush3.bf16.msra.mxu0 %v2703_v41  ;;  %2353 = vmatpush3.bf16.msra.mxu1 %v2704_v42 }
 0x157   :  { %2397 = vmatprep.subr.bf16.mxu0 %v2740_v32  ;;  %2354 = vmatprep.subr.bf16.mxu1 %v2705_v43 }
 0x15a   :  { %2398 = vmatpush3.bf16.msra.mxu0 %v2706_v44  ;;  %2355 = vmatpush3.bf16.msra.mxu1 %v2707_v46 }
 0x15b   :  { %2399 = vmatprep.subr.bf16.mxu0 %v2740_v32  ;;  %2356 = vmatprep.subr.bf16.mxu1 %v2708_v47  ;;  %v1130_v32 = vrot.slane %v1125_v50, %v159_v56 }
 0x15e   :  { %2400 = vmatpush3.bf16.msra.mxu0 %v2709_v48  ;;  %2357 = vmatpush3.bf16.msra.mxu1 %v2710_v49 }
 0x161   :  { %2402 = vmatmul.mubr.bf16.vlgmr.msra.gmra.mxu0 %v964_v27  ;;  %1985 = vmatmul.mubr.bf16.vlgmr.msra.gmra.mxu1 %v3376_v45 }
 0x1d0   :  { %v1816_v22 = vpop.f32.mrf.mxu1 }
 0x1d1   :  { %v1817_v60 = vadd.f32 %v1816_v22, %v1130_v32 }
 0x1d2   :  { %v1818_v51 = vpop.f32.mrf.mxu1 }
 0x1d3   :  { %v1819_v63 = vadd.f32 %v1818_v51, %v1134_v59 }
 0x1d4   :  { %v1820_v54 = vpop.f32.mrf.mxu1 }
 0x1d5   :  { %v1821_v3 = vadd.f32 %v1820_v54, %v1130_v32 }
 0x1d6   :  { %v1822_v61 = vpop.f32.mrf.mxu1 }
 0x1d7   :  { %v1823_v7 = vadd.f32 %v1822_v61, %v1134_v59 }
 0x1e1   :  { %v1859_v52 = vpop.f32.mrf.mxu0 }
 0x1e2   :  { %v1860_v45 = vadd.f32 %v1859_v52, %v1817_v60  ;;  %v2716_v52 = vld [vmem:[%s3565_s0 + $0x28] sm:$0xff] }
 0x1e3   :  { %v1861_v58 = vpop.f32.mrf.mxu0 }
 0x1e4   :  { %v1862_v4 = vadd.f32 %v1861_v58, %v1819_v63 }
 0x1e5   :  { %v1863_v62 = vpop.f32.mrf.mxu0 }
 0x1e6   :  { %v1864_v8 = vadd.f32 %v1863_v62, %v1821_v3 }
 0x1e7   :  { %v1865_v6 = vpop.f32.mrf.mxu0 }
 0x1e8   :  { %v1866_v11 = vadd.f32 %v1865_v6, %v1823_v7 }
 0x201   :  { %v1902_v0 = vpop.f32.mrf.mxu1  ;;  %v2336_v27 = vpop.f32.mrf.mxu0 }
 0x202   :  { %v1903_v5 = vadd.f32 %v1902_v0, %v1860_v45 }
 0x203   :  { %v1904_v56 = vpop.f32.mrf.mxu1  ;;  %v2337_v28 = vpop.f32.mrf.mxu0 }
 0x204   :  { %v2036_v9 = vmul.f32 %v2035_v1, %v1903_v5  ;;  %v1905_v10 = vadd.f32 %v1904_v56, %v1862_v4  ;;  %v2338_v31 = vadd.f32 %v2337_v28, %v2336_v27 }
 0x205   :  { %v1906_v55 = vpop.f32.mrf.mxu1  ;;  %v2339_v29 = vpop.f32.mrf.mxu0 }
 0x206   :  { %v2042_v13 = vadd.f32 %v2711_v12, %v2036_v9  ;;  %v2037_v15 = vmul.f32 %v2035_v1, %v1905_v10  ;;  %v1907_v16 = vadd.f32 %v1906_v55, %v1864_v8  ;;  %v1946_v37 = vadd.f32 %v2338_v31, %v1138_v14 }
 0x207   :  { %v1908_v18 = vpop.f32.mrf.mxu1  ;;  %v2340_v30 = vpop.f32.mrf.mxu0 }
 0x208   :  { %2048 = vst [vmem:[#allocation3] sm:$0xff] %v2042_v13  ;;  %v2043_v20 = vadd.f32 %v2712_v19, %v2037_v15  ;;  %v2039_v21 = vmul.f32 %v2035_v1, %v1907_v16  ;;  %v1909_v57 = vadd.f32 %v1908_v18, %v1866_v11  ;;  %v2341_v38 = vadd.f32 %v2340_v30, %v2339_v29 }
 0x20a   :  { %2049 = vst [vmem:[#allocation3 + $0x8] sm:$0xff] %v2043_v20  ;;  %v2045_v24 = vadd.f32 %v2713_v23, %v2039_v21  ;;  %v2040_v25 = vmul.f32 %v2035_v1, %v1909_v57  ;;  %v1949_v46 = vadd.f32 %v2341_v38, %v1138_v14 }
 0x20c   :  { %2051 = vst [vmem:[#allocation3 + $0x18] sm:$0xff] %v2045_v24  ;;  %v2046_v2 = vadd.f32 %v2714_v26, %v2040_v25 }
 0x20e   :  { %2052 = vst [vmem:[#allocation3 + $0x20] sm:$0xff] %v2046_v2 }
 0x221   :  { %v2027_v33 = vpop.f32.mrf.mxu0  ;;  %v2358_v34 = vpop.f32.mrf.mxu1 }
 0x223   :  { %v2403_v35 = vpop.f32.mrf.mxu0  ;;  %v2359_v36 = vpop.f32.mrf.mxu1 }
 0x224   :  { %v2360_v39 = vadd.f32 %v2359_v36, %v2358_v34 }
 0x225   :  { %v2030_v40 = vpop.f32.mrf.mxu0  ;;  %v2361_v41 = vpop.f32.mrf.mxu1 }
 0x226   :  { %v1987_v42 = vadd.f32 %v2360_v39, %v1946_v37 }
 0x227   :  { %v2404_v43 = vpop.f32.mrf.mxu0  ;;  %v2362_v44 = vpop.f32.mrf.mxu1 }
 0x228   :  { %v2028_v47 = vadd.f32 %v2027_v33, %v1987_v42  ;;  %v2363_v48 = vadd.f32 %v2362_v44, %v2361_v41 }
 0x22a   :  { %v2038_v49 = vmul.f32 %v2035_v1, %v2028_v47  ;;  %v1990_v22 = vadd.f32 %v2363_v48, %v1949_v46 }
 0x22c   :  { %v2044_v17 = vadd.f32 %v2715_v53, %v2038_v49  ;;  %v2031_v50 = vadd.f32 %v2030_v40, %v1990_v22 }
 0x22e   :  { %2050 = vst.msk [vmem:[#allocation3 + $0x10] sm:$0xff] %vm702_vm0, %v2044_v17  ;;  %v2041_v51 = vmul.f32 %v2035_v1, %v2031_v50 }
 0x230   :  { %v2047_v32 = vadd.f32 %v2716_v52, %v2041_v51 }
 0x232   :  { %2053 = vst.msk [vmem:[#allocation3 + $0x28] sm:$0xff] %vm702_vm0, %v2047_v32 }
 0x233   :  { %2728 = shalt.err (!%p2725_p4)
}
 0x234   :  { %s2743_s20 = smov 384   ;;  %s2744_s21 = smov 24  }
 0x235   :  { %2065 = dma.vmem_to_hbm [thread:$0]  %s2060_s16, 768, %s3571_s6, [#allocation4], %s2743_s20, %s2743_s20, %s2744_s21  }
 0x236   :  { %2737 = dma.done.wait [#allocation4], 768  }
 0x237   :  { %2738 = vsyncadd [#allocation4], 4294966528 }
 0x238   :  { %2069 = vsyncpa [#allocation4], 1 }

</bundles_post_ra>
